<compile_context>
chip_gen: v7x
topology: tpu7x:2x2x1
jax: 0.10.0
libtpu: 0.0.40
codegen_flags: <defaults>
</compile_context>

<pallas_src>
import functools

import jax
import jax.numpy as jnp
from jax import lax
from jax.experimental import pallas as pl
from jax.experimental.pallas import tpu as pltpu


def _round_down(a: int, b: int) -> int:
    return a // b * b


def _focal_loss_kernel(x_ref, t_ref, ce_out_ref, focal_out_ref,
                       acc_ce_ref, acc_focal_ref, *,
                       gamma: float, num_classes: int, hw: int,
                       pos_per_tile: int, num_tiles: int, tiles_per_split: int):
    s = pl.program_id(1)           # core-split index
    j = pl.program_id(2)           # tile index within this split (reduction axis)

    @pl.when(j == 0)
    def _init():
        acc_ce_ref[...] = jnp.zeros_like(acc_ce_ref)
        acc_focal_ref[...] = jnp.zeros_like(acc_focal_ref)

    C = num_classes
    # x_ref block: (1, C, S, L); t_ref block: (1, 1, S, L).
    xs = [x_ref[0, c].astype(jnp.float32) for c in range(C)]   # C dense (S, L) slabs
    t = t_ref[0, 0]
    if t.dtype != jnp.int32:
        t = t.astype(jnp.int32)                                # int16 targets supported

    # Channel max: C-1 cross-slab elementwise maxes (pure VALU).
    m = xs[0]
    for c in range(1, C):
        m = jnp.maximum(m, xs[c])

    need_pt = gamma != 0.0
    denom = None     # sum_c exp(x_c - m)
    xm_t = None      # x_t - m           (gathered via one-hot selects)
    ex_t = None      # exp(x_t - m)      (only needed when gamma != 0)
    for c in range(C):
        xm = xs[c] - m
        ex = jnp.exp(xm)
        denom = ex if denom is None else denom + ex
        sel = t == c
        gx = jnp.where(sel, xm, 0.0)
        xm_t = gx if xm_t is None else xm_t + gx
        if need_pt:
            ge = jnp.where(sel, ex, 0.0)
            ex_t = ge if ex_t is None else ex_t + ge

    ce = jnp.log(denom) - xm_t       # per-position cross entropy (= lse - x_t)

    if need_pt:
        # p_t without a second exp; exact reciprocal keeps 1e-5-level accuracy
        # (pl.reciprocal(denom, approx=True) is near-free on the EUP if the
        #  caller can tolerate the approximation).
        p_t = ex_t * pl.reciprocal(denom)
        one_m = 1.0 - p_t
        g = float(gamma)
        if g.is_integer() and 0.0 < g <= 8.0:
            focal = one_m
            for _ in range(int(g) - 1):
                focal = focal * one_m
        else:
            focal = jnp.maximum(one_m, 0.0) ** jnp.float32(g)
    else:
        focal = None                 # (1 - p_t) ** 0 == 1 for every valid position

    S_blk, L_blk = ce.shape

    def _accum(masked: bool):
        if masked:
            # Only the final (partial) tile runs this path.
            row_i = lax.broadcasted_iota(jnp.int32, (S_blk, L_blk), 0)
            lane_i = lax.broadcasted_iota(jnp.int32, (S_blk, L_blk), 1)
            logical_tile = s * tiles_per_split + j
            flat = logical_tile * pos_per_tile + row_i * L_blk + lane_i
            valid = flat < hw
            ce_v = jnp.where(valid, ce, 0.0)
            if focal is None:
                focal_v = valid.astype(jnp.float32)
            else:
                focal_v = jnp.where(valid, focal, 0.0)
        else:
            ce_v = ce
            focal_v = jnp.ones_like(ce) if focal is None else focal
        acc_ce_ref[...] += jnp.sum(ce_v, axis=0, keepdims=True)
        acc_focal_ref[...] += jnp.sum(focal_v, axis=0, keepdims=True)

    mask_possible = (hw % pos_per_tile) != 0
    if not mask_possible:
        _accum(False)
    elif num_tiles == 1:
        _accum(True)
    else:
        logical_tile = s * tiles_per_split + j

        @pl.when(logical_tile < num_tiles - 1)
        def _full_tile():
            _accum(False)

        @pl.when(logical_tile == num_tiles - 1)
        def _tail_tile():
            _accum(True)

    @pl.when(j == pl.num_programs(2) - 1)
    def _finalize():
        ce_out_ref[...] = jnp.broadcast_to(jnp.sum(acc_ce_ref[...]), ce_out_ref.shape)
        focal_out_ref[...] = jnp.broadcast_to(jnp.sum(acc_focal_ref[...]),
                                              focal_out_ref.shape)


def focal_loss(logits_nchw: jax.Array, target_nhw: jax.Array,
               gamma: float = 0.0, block_bytes: int = 2 << 20) -> jax.Array:
    """FocalLoss.forward. logits: (N, C, H, W) float, target: (N, H, W) int."""
    N, C, H, W = logits_nchw.shape
    HW = H * W
    P = N * HW
    itemsize = jnp.dtype(logits_nchw.dtype).itemsize

    t = target_nhw
    if t.dtype not in (jnp.int32, jnp.int16):   # narrow targets pass straight through
        t = t.astype(jnp.int32)

    if HW % 128 == 0:
        # Dense layout: spatial positions fill sublanes AND lanes (free reshape).
        R = HW // 128
        s_cap = block_bytes // (C * itemsize * 128)
        s_cap = max(8, s_cap - (s_cap % 8))
        S = R if R <= s_cap else s_cap            # full-dim block or multiple of 8
        x4 = logits_nchw.reshape(N, C, R, 128)
        t4 = t.reshape(N, 1, R, 128)
        blk_x, blk_t = (1, C, S, 128), (1, 1, S, 128)
        L_blk, tiled_axis = 128, 2
    else:
        # Fallback (HW not a multiple of 128): positions on lanes only, no pad;
        # the tail of the last tile is masked in-kernel.
        if HW < 128:
            L = HW
        else:
            l_cap = block_bytes // (C * itemsize)
            l_cap = max(128, l_cap - (l_cap % 128))
            L = min(l_cap, _round_down(HW, 128))
        x4 = logits_nchw.reshape(N, C, 1, HW)
        t4 = t.reshape(N, 1, 1, HW)
        blk_x, blk_t = (1, C, 1, L), (1, 1, 1, L)
        S, L_blk, tiled_axis = 1, L, 3

    pos_per_tile = S * L_blk
    num_tiles = pl.cdiv(HW, pos_per_tile)
    # v7x core split: a second "parallel" axis splits the tile range so both
    # TensorCores are busy even when N == 1 (only when it divides evenly).
    nsplit = 2 if (num_tiles >= 2 and num_tiles % 2 == 0) else 1
    tps = num_tiles // nsplit

    if tiled_axis == 2:
        x_map = lambda n, s, j: (n, 0, s * tps + j, 0)
        t_map = lambda n, s, j: (n, 0, s * tps + j, 0)
    else:
        x_map = lambda n, s, j: (n, 0, 0, s * tps + j)
        t_map = lambda n, s, j: (n, 0, 0, s * tps + j)

    kernel = functools.partial(
        _focal_loss_kernel, gamma=float(gamma), num_classes=C, hw=HW,
        pos_per_tile=pos_per_tile, num_tiles=num_tiles, tiles_per_split=tps)

    ce_part, focal_part = pl.pallas_call(
        kernel,
        out_shape=(jax.ShapeDtypeStruct((N, nsplit, 1, 128), jnp.float32),
                   jax.ShapeDtypeStruct((N, nsplit, 1, 128), jnp.float32)),
        grid_spec=pltpu.PrefetchScalarGridSpec(
            num_scalar_prefetch=0,
            grid=(N, nsplit, tps),
            in_specs=[
                pl.BlockSpec(blk_x, x_map),
                pl.BlockSpec(blk_t, t_map),
            ],
            out_specs=[
                pl.BlockSpec((1, 1, 1, 128), lambda n, s, j: (n, s, 0, 0)),
                pl.BlockSpec((1, 1, 1, 128), lambda n, s, j: (n, s, 0, 0)),
            ],
            scratch_shapes=[
                pltpu.VMEM((1, L_blk), jnp.float32),   # running per-lane CE sum
                pltpu.VMEM((1, L_blk), jnp.float32),   # running (1 - p_t)^gamma sum
            ],
        ),
        compiler_params=pltpu.CompilerParams(
            dimension_semantics=("parallel", "parallel", "arbitrary"),
            vmem_limit_bytes=32 * 1024 * 1024),
    )(x4, t4)

    ce_sum = jnp.sum(ce_part[:, :, 0, 0])
    focal_sum = jnp.sum(focal_part[:, :, 0, 0])
    return (ce_sum / jnp.float32(P)) * focal_sum


def focal_loss_ref(logits_nchw, target_nhw, gamma=0.0):
    """Pure-JAX reference mirroring the PyTorch forward."""
    N, C, H, W = logits_nchw.shape
    x = jnp.transpose(logits_nchw, (0, 2, 3, 1)).reshape(-1, C).astype(jnp.float32)
    t = target_nhw.astype(jnp.int32).reshape(-1)
    lse = jax.scipy.special.logsumexp(x, axis=-1)
    x_t = jnp.take_along_axis(x, t[:, None], axis=-1)[:, 0]
    ce_mean = jnp.mean(lse - x_t)
    p_t = jnp.exp(x_t - lse)
    return ce_mean * jnp.sum((1.0 - p_t) ** gamma)


if __name__ == "__main__":
    key = jax.random.PRNGKey(0)
    k1, k2, k3, k4, k5, k6 = jax.random.split(key, 6)

    # Primary shape from the module context: N=2, C=4, 16x16 spatial.
    N, C, H, W = 2, 4, 16, 16
    logits = jax.random.normal(k1, (N, C, H, W), dtype=jnp.float32)
    target = jax.random.randint(k2, (N, H, W), 0, C, dtype=jnp.int32)

    out = jax.block_until_ready(focal_loss(logits, target, gamma=2.0))
    ref = focal_loss_ref(logits, target, gamma=2.0)
    assert jnp.allclose(out, ref, rtol=1e-5, atol=1e-5), (out, ref)

    # gamma == 0 (module default) specialization.
    out0 = jax.block_until_ready(focal_loss(logits, target, gamma=0.0))
    ref0 = focal_loss_ref(logits, target, gamma=0.0)
    assert jnp.allclose(out0, ref0, rtol=1e-5, atol=1e-5), (out0, ref0)

    # H*W not a multiple of 128: exercises the lane-only fallback layout, the
    # in-kernel tail mask (no wrapper pad) and the 2-way core split.
    logits2 = jax.random.normal(k3, (1, 3, 20, 24), dtype=jnp.float32)
    target2 = jax.random.randint(k4, (1, 20, 24), 0, 3, dtype=jnp.int32)
    out2 = jax.block_until_ready(focal_loss(logits2, target2, gamma=2.0))
    ref2 = focal_loss_ref(logits2, target2, gamma=2.0)
    assert jnp.allclose(out2, ref2, rtol=1e-5, atol=1e-5), (out2, ref2)

    # Tiny block budget: forces multiple tiles per (image, split) so the
    # accumulate-across-grid-steps path (pl.when init/finalize) is exercised.
    logits3 = jax.random.normal(k5, (2, 4, 64, 64), dtype=jnp.float32)
    target3 = jax.random.randint(k6, (2, 64, 64), 0, 4, dtype=jnp.int32)
    out3 = jax.block_until_ready(focal_loss(logits3, target3, gamma=2.0,
                                            block_bytes=8192))
    ref3 = focal_loss_ref(logits3, target3, gamma=2.0)
    assert jnp.allclose(out3, ref3, rtol=1e-5, atol=1e-5), (out3, ref3)

    print("KERNEL_OK")
</pallas_src>

<mosaic_0001>
module attributes {stable_mosaic.version = 11 : i64} {
  func.func @_focal_loss_kernel(%arg0: i32, %arg1: i32, %arg2: i32, %arg3: memref<1x4x2x128xf32, #tpu.memory_space<vmem>>, %arg4: memref<1x1x2x128xi32, #tpu.memory_space<vmem>>, %arg5: memref<1x1x1x128xf32, #tpu.memory_space<vmem>>, %arg6: memref<1x1x1x128xf32, #tpu.memory_space<vmem>>, %arg7: memref<1x128xf32, #tpu.memory_space<vmem>>, %arg8: memref<1x128xf32, #tpu.memory_space<vmem>>) attributes {dimension_semantics = [#tpu.dimension_semantics<parallel>, #tpu.dimension_semantics<parallel>, #tpu.dimension_semantics<arbitrary>], iteration_bounds = array<i64: 2, 1, 1>, scalar_prefetch = 0 : i64, scratch_operands = 2 : i64, tpu.core_type = #tpu.core_type<tc>, window_params = [{transform_indices = @transform_0, window_bounds = array<i64: 1, 4, 2, 128>}, {transform_indices = @transform_1, window_bounds = array<i64: 1, 1, 2, 128>}, {transform_indices = @transform_2, window_bounds = array<i64: 1, 1, 1, 128>}, {transform_indices = @transform_3, window_bounds = array<i64: 1, 1, 1, 128>}]} {
    %c0_i32 = arith.constant 0 : i32
    %0 = arith.cmpi eq, %arg2, %c0_i32 : i32
    %1 = arith.extui %0 : i1 to i32
    %c0_i32_0 = arith.constant 0 : i32
    %2 = arith.cmpi ne, %1, %c0_i32_0 : i32
    scf.if %2 {
      %cst_38 = arith.constant 0.000000e+00 : f32
      %77 = vector.broadcast %cst_38 : f32 to vector<1x128xf32>
      %c0_39 = arith.constant 0 : index
      %c0_40 = arith.constant 0 : index
      %78 = vector.load %arg7[%c0_39, %c0_40] : memref<1x128xf32, #tpu.memory_space<vmem>>, vector<1x128xf32>
      tpu.vector_store %arg7[%c0_39, %c0_40], %77 {strides = array<i32>} : memref<1x128xf32, #tpu.memory_space<vmem>>, vector<1x128xf32>,
      %cst_41 = arith.constant 0.000000e+00 : f32
      %79 = vector.broadcast %cst_41 : f32 to vector<1x128xf32>
      %c0_42 = arith.constant 0 : index
      %c0_43 = arith.constant 0 : index
      %80 = vector.load %arg8[%c0_42, %c0_43] : memref<1x128xf32, #tpu.memory_space<vmem>>, vector<1x128xf32>
      tpu.vector_store %arg8[%c0_42, %c0_43], %79 {strides = array<i32>} : memref<1x128xf32, #tpu.memory_space<vmem>>, vector<1x128xf32>,
    } else {
    }
    %c0 = arith.constant 0 : index
    %c0_1 = arith.constant 0 : index
    %c0_2 = arith.constant 0 : index
    %c0_3 = arith.constant 0 : index
    %3 = vector.load %arg3[%c0, %c0_1, %c0_2, %c0_3] : memref<1x4x2x128xf32, #tpu.memory_space<vmem>>, vector<1x1x2x128xf32>
    %4 = vector.shape_cast %3 : vector<1x1x2x128xf32> to vector<2x128xf32>
    %c0_4 = arith.constant 0 : index
    %c1 = arith.constant 1 : index
    %c0_5 = arith.constant 0 : index
    %c0_6 = arith.constant 0 : index
    %5 = vector.load %arg3[%c0_4, %c1, %c0_5, %c0_6] : memref<1x4x2x128xf32, #tpu.memory_space<vmem>>, vector<1x1x2x128xf32>
    %6 = vector.shape_cast %5 : vector<1x1x2x128xf32> to vector<2x128xf32>
    %c0_7 = arith.constant 0 : index
    %c2 = arith.constant 2 : index
    %c0_8 = arith.constant 0 : index
    %c0_9 = arith.constant 0 : index
    %7 = vector.load %arg3[%c0_7, %c2, %c0_8, %c0_9] : memref<1x4x2x128xf32, #tpu.memory_space<vmem>>, vector<1x1x2x128xf32>
    %8 = vector.shape_cast %7 : vector<1x1x2x128xf32> to vector<2x128xf32>
    %c0_10 = arith.constant 0 : index
    %c3 = arith.constant 3 : index
    %c0_11 = arith.constant 0 : index
    %c0_12 = arith.constant 0 : index
    %9 = vector.load %arg3[%c0_10, %c3, %c0_11, %c0_12] : memref<1x4x2x128xf32, #tpu.memory_space<vmem>>, vector<1x1x2x128xf32>
    %10 = vector.shape_cast %9 : vector<1x1x2x128xf32> to vector<2x128xf32>
    %c0_13 = arith.constant 0 : index
    %c0_14 = arith.constant 0 : index
    %c0_15 = arith.constant 0 : index
    %c0_16 = arith.constant 0 : index
    %11 = vector.load %arg4[%c0_13, %c0_14, %c0_15, %c0_16] : memref<1x1x2x128xi32, #tpu.memory_space<vmem>>, vector<1x1x2x128xi32>
    %12 = vector.shape_cast %11 : vector<1x1x2x128xi32> to vector<2x128xi32>
    %13 = arith.maximumf %4, %6 : vector<2x128xf32>
    %14 = arith.maximumf %13, %8 : vector<2x128xf32>
    %15 = arith.maximumf %14, %10 : vector<2x128xf32>
    %16 = arith.subf %4, %15 : vector<2x128xf32>
    %17 = math.exp %16 : vector<2x128xf32>
    %c0_i32_17 = arith.constant 0 : i32
    %18 = vector.broadcast %c0_i32_17 : i32 to vector<2x128xi32>
    %19 = arith.cmpi eq, %12, %18 : vector<2x128xi32>
    %cst = arith.constant 0.000000e+00 : f32
    %20 = vector.broadcast %cst : f32 to vector<2x128xf32>
    %21 = arith.select %19, %16, %20 : vector<2x128xi1>, vector<2x128xf32>
    %cst_18 = arith.constant 0.000000e+00 : f32
    %22 = vector.broadcast %cst_18 : f32 to vector<2x128xf32>
    %23 = arith.select %19, %17, %22 : vector<2x128xi1>, vector<2x128xf32>
    %24 = arith.subf %6, %15 : vector<2x128xf32>
    %25 = math.exp %24 : vector<2x128xf32>
    %26 = arith.addf %17, %25 : vector<2x128xf32>
    %c1_i32 = arith.constant 1 : i32
    %27 = vector.broadcast %c1_i32 : i32 to vector<2x128xi32>
    %28 = arith.cmpi eq, %12, %27 : vector<2x128xi32>
    %cst_19 = arith.constant 0.000000e+00 : f32
    %29 = vector.broadcast %cst_19 : f32 to vector<2x128xf32>
    %30 = arith.select %28, %24, %29 : vector<2x128xi1>, vector<2x128xf32>
    %31 = arith.addf %21, %30 : vector<2x128xf32>
    %cst_20 = arith.constant 0.000000e+00 : f32
    %32 = vector.broadcast %cst_20 : f32 to vector<2x128xf32>
    %33 = arith.select %28, %25, %32 : vector<2x128xi1>, vector<2x128xf32>
    %34 = arith.addf %23, %33 : vector<2x128xf32>
    %35 = arith.subf %8, %15 : vector<2x128xf32>
    %36 = math.exp %35 : vector<2x128xf32>
    %37 = arith.addf %26, %36 : vector<2x128xf32>
    %c2_i32 = arith.constant 2 : i32
    %38 = vector.broadcast %c2_i32 : i32 to vector<2x128xi32>
    %39 = arith.cmpi eq, %12, %38 : vector<2x128xi32>
    %cst_21 = arith.constant 0.000000e+00 : f32
    %40 = vector.broadcast %cst_21 : f32 to vector<2x128xf32>
    %41 = arith.select %39, %35, %40 : vector<2x128xi1>, vector<2x128xf32>
    %42 = arith.addf %31, %41 : vector<2x128xf32>
    %cst_22 = arith.constant 0.000000e+00 : f32
    %43 = vector.broadcast %cst_22 : f32 to vector<2x128xf32>
    %44 = arith.select %39, %36, %43 : vector<2x128xi1>, vector<2x128xf32>
    %45 = arith.addf %34, %44 : vector<2x128xf32>
    %46 = arith.subf %10, %15 : vector<2x128xf32>
    %47 = math.exp %46 : vector<2x128xf32>
    %48 = arith.addf %37, %47 : vector<2x128xf32>
    %c3_i32 = arith.constant 3 : i32
    %49 = vector.broadcast %c3_i32 : i32 to vector<2x128xi32>
    %50 = arith.cmpi eq, %12, %49 : vector<2x128xi32>
    %cst_23 = arith.constant 0.000000e+00 : f32
    %51 = vector.broadcast %cst_23 : f32 to vector<2x128xf32>
    %52 = arith.select %50, %46, %51 : vector<2x128xi1>, vector<2x128xf32>
    %53 = arith.addf %42, %52 : vector<2x128xf32>
    %cst_24 = arith.constant 0.000000e+00 : f32
    %54 = vector.broadcast %cst_24 : f32 to vector<2x128xf32>
    %55 = arith.select %50, %47, %54 : vector<2x128xi1>, vector<2x128xf32>
    %56 = arith.addf %45, %55 : vector<2x128xf32>
    %57 = math.log %48 : vector<2x128xf32>
    %58 = arith.subf %57, %53 : vector<2x128xf32>
    %59 = tpu.reciprocal %48 : vector<2x128xf32> -> vector<2x128xf32>
    %60 = arith.mulf %56, %59 : vector<2x128xf32>
    %cst_25 = arith.constant 1.000000e+00 : f32
    %61 = vector.broadcast %cst_25 : f32 to vector<2x128xf32>
    %62 = arith.subf %61, %60 : vector<2x128xf32>
    %63 = arith.mulf %62, %62 : vector<2x128xf32>
    %c0_26 = arith.constant 0 : index
    %c0_27 = arith.constant 0 : index
    %64 = vector.load %arg7[%c0_26, %c0_27] : memref<1x128xf32, #tpu.memory_space<vmem>>, vector<1x128xf32>
    %cst_28 = arith.constant dense<0.000000e+00> : vector<128xf32>
    %65 = vector.multi_reduction <add>, %58, %cst_28 [0] : vector<2x128xf32> to vector<128xf32>
    %66 = vector.shape_cast %65 : vector<128xf32> to vector<1x128xf32>
    %67 = arith.addf %64, %66 : vector<1x128xf32>
    %c0_29 = arith.constant 0 : index
    %c0_30 = arith.constant 0 : index
    %68 = vector.load %arg7[%c0_29, %c0_30] : memref<1x128xf32, #tpu.memory_space<vmem>>, vector<1x128xf32>
    tpu.vector_store %arg7[%c0_29, %c0_30], %67 {strides = array<i32>} : memref<1x128xf32, #tpu.memory_space<vmem>>, vector<1x128xf32>,
    %c0_31 = arith.constant 0 : index
    %c0_32 = arith.constant 0 : index
    %69 = vector.load %arg8[%c0_31, %c0_32] : memref<1x128xf32, #tpu.memory_space<vmem>>, vector<1x128xf32>
    %cst_33 = arith.constant dense<0.000000e+00> : vector<128xf32>
    %70 = vector.multi_reduction <add>, %63, %cst_33 [0] : vector<2x128xf32> to vector<128xf32>
    %71 = vector.shape_cast %70 : vector<128xf32> to vector<1x128xf32>
    %72 = arith.addf %69, %71 : vector<1x128xf32>
    %c0_34 = arith.constant 0 : index
    %c0_35 = arith.constant 0 : index
    %73 = vector.load %arg8[%c0_34, %c0_35] : memref<1x128xf32, #tpu.memory_space<vmem>>, vector<1x128xf32>
    tpu.vector_store %arg8[%c0_34, %c0_35], %72 {strides = array<i32>} : memref<1x128xf32, #tpu.memory_space<vmem>>, vector<1x128xf32>,
    %c0_i32_36 = arith.constant 0 : i32
    %74 = arith.cmpi eq, %arg2, %c0_i32_36 : i32
    %75 = arith.extui %74 : i1 to i32
    %c0_i32_37 = arith.constant 0 : i32
    %76 = arith.cmpi ne, %75, %c0_i32_37 : i32
    scf.if %76 {
      %c0_38 = arith.constant 0 : index
      %c0_39 = arith.constant 0 : index
      %77 = vector.load %arg7[%c0_38, %c0_39] : memref<1x128xf32, #tpu.memory_space<vmem>>, vector<1x128xf32>
      %78 = vector.shape_cast %77 : vector<1x128xf32> to vector<1x1x128xf32>
      %cst_40 = arith.constant dense<0.000000e+00> : vector<1xf32>
      %79 = vector.multi_reduction <add>, %78, %cst_40 [1, 2] : vector<1x1x128xf32> to vector<1xf32>
      %80 = vector.shape_cast %79 : vector<1xf32> to vector<1x1x1xf32>
      %81 = vector.extract %80[0, 0, 0] : f32 from vector<1x1x1xf32>
      %82 = vector.broadcast %81 : f32 to vector<1x1x1x128xf32>
      %c0_41 = arith.constant 0 : index
      %c0_42 = arith.constant 0 : index
      %c0_43 = arith.constant 0 : index
      %c0_44 = arith.constant 0 : index
      %83 = vector.load %arg5[%c0_41, %c0_42, %c0_43, %c0_44] : memref<1x1x1x128xf32, #tpu.memory_space<vmem>>, vector<1x1x1x128xf32>
      tpu.vector_store %arg5[%c0_41, %c0_42, %c0_43, %c0_44], %82 {strides = array<i32>} : memref<1x1x1x128xf32, #tpu.memory_space<vmem>>, vector<1x1x1x128xf32>,
      %c0_45 = arith.constant 0 : index
      %c0_46 = arith.constant 0 : index
      %84 = vector.load %arg8[%c0_45, %c0_46] : memref<1x128xf32, #tpu.memory_space<vmem>>, vector<1x128xf32>
      %85 = vector.shape_cast %84 : vector<1x128xf32> to vector<1x1x128xf32>
      %cst_47 = arith.constant dense<0.000000e+00> : vector<1xf32>
      %86 = vector.multi_reduction <add>, %85, %cst_47 [1, 2] : vector<1x1x128xf32> to vector<1xf32>
      %87 = vector.shape_cast %86 : vector<1xf32> to vector<1x1x1xf32>
      %88 = vector.extract %87[0, 0, 0] : f32 from vector<1x1x1xf32>
      %89 = vector.broadcast %88 : f32 to vector<1x1x1x128xf32>
      %c0_48 = arith.constant 0 : index
      %c0_49 = arith.constant 0 : index
      %c0_50 = arith.constant 0 : index
      %c0_51 = arith.constant 0 : index
      %90 = vector.load %arg6[%c0_48, %c0_49, %c0_50, %c0_51] : memref<1x1x1x128xf32, #tpu.memory_space<vmem>>, vector<1x1x1x128xf32>
      tpu.vector_store %arg6[%c0_48, %c0_49, %c0_50, %c0_51], %89 {strides = array<i32>} : memref<1x1x1x128xf32, #tpu.memory_space<vmem>>, vector<1x1x1x128xf32>,
    } else {
    }
    return
  }
  func.func @transform_0(%arg0: i32, %arg1: i32, %arg2: i32) -> (i32, i32, i32, i32) {
    %c1_i32 = arith.constant 1 : i32
    %0 = arith.muli %arg1, %c1_i32 : i32
    %1 = arith.addi %0, %arg2 : i32
    %c0_i32 = arith.constant 0 : i32
    %c0_i32_0 = arith.constant 0 : i32
    %c0_i32_1 = arith.constant 0 : i32
    return %arg0, %c0_i32, %1, %c0_i32_0 : i32, i32, i32, i32
  }
  func.func @transform_1(%arg0: i32, %arg1: i32, %arg2: i32) -> (i32, i32, i32, i32) {
    %c1_i32 = arith.constant 1 : i32
    %0 = arith.muli %arg1, %c1_i32 : i32
    %1 = arith.addi %0, %arg2 : i32
    %c0_i32 = arith.constant 0 : i32
    %c0_i32_0 = arith.constant 0 : i32
    %c0_i32_1 = arith.constant 0 : i32
    return %arg0, %c0_i32, %1, %c0_i32_0 : i32, i32, i32, i32
  }
  func.func @transform_2(%arg0: i32, %arg1: i32, %arg2: i32) -> (i32, i32, i32, i32) {
    %c0_i32 = arith.constant 0 : i32
    %c0_i32_0 = arith.constant 0 : i32
    %c0_i32_1 = arith.constant 0 : i32
    return %arg0, %arg1, %c0_i32, %c0_i32_0 : i32, i32, i32, i32
  }
  func.func @transform_3(%arg0: i32, %arg1: i32, %arg2: i32) -> (i32, i32, i32, i32) {
    %c0_i32 = arith.constant 0 : i32
    %c0_i32_0 = arith.constant 0 : i32
    %c0_i32_1 = arith.constant 0 : i32
    return %arg0, %arg1, %c0_i32, %c0_i32_0 : i32, i32, i32, i32
  }
}

</mosaic_0001>

<bundles_post_ra>
// kernel: tpu_custom_call.1
= control target key start
LH: loop header
LB: loop body
LE: loop exit
PB: predicated region body
PF: predicated region fallthrough
CT: control target
= control target key end

     0   :  { %9 = vsyncpa [#allocation5], 0  ;;  %s1119_s0 = inlined_call_operand.hbm [shape: f32[2,4,2,128], index: 0, kind: input, shape index: {}]   ;;  %s1120_s1 = inlined_call_operand.hbm [shape: s32[2,1,2,128], index: 1, kind: input, shape index: {}]   ;;  %s1121_s2 = inlined_call_operand.hbm [shape: f32[2,1,1,128], index: 2, kind: output, shape index: {0}]   ;;  %s1122_s3 = inlined_call_operand.hbm [shape: f32[2,1,1,128], index: 3, kind: output, shape index: {1}]  }
   0x1   :  { %11 = vsyncpa [#allocation5 + $0x1], 0 }
   0x2   :  { %12 = vsyncpa [#allocation8], 0 }
   0x3   :  { %14 = vsyncpa [#allocation8 + $0x1], 0 }
   0x4   :  { %15 = vsyncpa [#allocation6], 0 }
   0x5   :  { %17 = vsyncpa [#allocation6 + $0x1], 0 }
   0x6   :  { %18 = vsyncpa [#allocation11], 0 }
   0x7   :  { %20 = vsyncpa [#allocation11 + $0x1], 0  ;;  %s865_s12 = smov 0   ;;  %s867_s13 = smov 0  }
   0x8   :  { %s869_s14 = smov 0   ;;  %s871_s15 = smov 0  }
   0x9   :  { %s873_s16 = smov 0   ;;  %s875_s17 = smov 0  }
   0xa LB: > { %s547_s18 = sadd.s32 4294967295, %s836_s17   ;;  %s548_s19 = sadd.s32 4294967294, %s836_s17   ;;  %s836_s17 = sphi %s875_s17, %s26_s17   ;;  %s832_s16 = sphi %s873_s16, %s1141_s16   ;;  %s828_s15 = sphi %s871_s15, %s1140_s15   ;;  %s824_s14 = sphi %s869_s14, %s1139_s14   ;;  %s820_s13 = sphi %s867_s13, %s1138_s13   ;;  %s816_s12 = sphi %s865_s12, %s1137_s12  }
   0xb   : > { %s45_s20 = sadd.s32 1, %s832_s16  ;;  %s56_s21 = sadd.s32 1, %s824_s14 }
   0xc   : > { %p47_p0 = scmp.ge.s32.totalorder %s45_s20, 2  ;;  %p63_p1 = scmp.ne.s32.totalorder %s824_s14, %s820_s13 }
   0xd   : > { %p64_p2 = scmp.eq.s32.totalorder %s836_s17, 0  ;;  %p69_p3 = scmp.ne.s32.totalorder %s820_s13, %s816_s12 }
   0xe   : > { %s1143_s20 = smov (%p47_p0, %s45_s20), 0  ;;  %p70_p5 = scmp.eq.s32.totalorder %s547_s18, 0 }
   0xf   : > { %p906_p4 = por %p64_p2, %p63_p1  ;;  %s51_s23 = ssub.s32 %s832_s16, %s1143_s20 }
  0x10   : > { %p125_p6 = scmp.eq.s32.totalorder %s547_s18, 1  ;;  %p54_p7 = scmp.eq.s32.totalorder %s51_s23, 0 }
  0x11   : > { %p912_p8 = por %p70_p5, %p69_p3  ;;  %p131_p10 = scmp.eq.s32.totalorder %s548_s19, 1 }
  0x12   : > { %p916_p9 = por %p125_p6, %p63_p1  ;;  %p593_p13 = scmp.lt.s32.totalorder %s836_s17, 2 }
  0x13   : > { %s1126_s24 = scalar_select %p912_p8, 1, 0 }
  0x14   : > { %s1127_s25 = scalar_select %p916_p9, 1, 0 }
  0x15   : > { %s921_s26 = scalar_select %p54_p7, %s824_s14, %s56_s21  }
  0x16   : > { %p923_p11 = por %p131_p10, %p69_p3  ;;  %s930_s28 = sand.u32 1, %s824_s14  }
  0x17   : > { %s551_s29 = sshll.u32 %s930_s28, 3  ;;  %s566_s30 = sshll.u32 %s832_s16, 7 }
  0x18   : > { %s1128_s27 = scalar_select %p923_p11, 1, 0 }
  0x19   : > { %s937_s6 = scalar_lea.hbm %s1119_s0, %s566_s30  ;;  %s183_s7 = scalar_lea.vmem [#allocation4], %s551_s29 }
  0x1a   : > { %s192_s8 = sshll.u32 %s183_s7, 4  ;;  %p943_p0 = pnand %p593_p13, %p906_p4  ;;  %s939_s8 = int_to_ptr.vmem [resolvable:$true] %s192_s8 }
  0x1b   : > { %s180_s10 = scalar_lea.sflag [#allocation5], %s930_s28  ;;  %s658_s11 = scalar_lea.hbm %s937_s6, 128 }
  0x1c   : > { %p659_p2 = scmp.ne.s32.totalorder %s937_s6, %s658_s11  ;;  %p660_p3 = pneg %p943_p0 }
  0x1d   : > { %s663_s21 = scalar_lea.hbm %s1119_s0, 256  ;;  %p664_p4 = scmp.lt.u32.totalorder %s937_s6, %s1119_s0 }
  0x1e   : > { %p661_p5 = pnand %p660_p3, %p659_p2  ;;  %p665_p7 = scmp.lt.u32.totalorder %s663_s21, %s658_s11 }
  0x1f   : > { %p667_p13 = scmp.lt.u32.totalorder %s658_s11, %s937_s6 }
  0x20   : > { %p662_p6 = pneg %p661_p5  ;;  %p666_p10 = por %p665_p7, %p664_p4 }
  0x22   : > { %p668_p12 = por %p667_p13, %p666_p10 }
  0x24   : > { %p669_p1 = pnand %p668_p12, %p662_p6 }
  0x26   : > { %672 = shalt.err (!%p669_p1)
}
  0x27   : > { %s673_s29 = scalar_lea.vmem %s939_s8, 128  ;;  %s838_s30 = smov [#allocation4]  }
  0x28   : > { %p674_p2 = scmp.ne.s32.totalorder %s939_s8, %s673_s29  ;;  %s678_s4 = sshll.u32 %s838_s30, 4  ;;  %s679_s4 = int_to_ptr.vmem [resolvable:$false] %s678_s4 }
  0x29   : > { %s680_s5 = scalar_lea.vmem %s679_s4, 256  ;;  %p681_p9 = scmp.lt.s32.totalorder %s939_s8, %s679_s4 }
  0x2a   : > { %p676_p5 = pnand %p674_p2, %p660_p3  ;;  %p682_p4 = scmp.lt.s32.totalorder %s680_s5, %s673_s29 }
  0x2c   : > { %p677_p11 = pneg %p676_p5  ;;  %p683_p7 = por %p682_p4, %p681_p9 }
  0x2e   : > { %p684_p10 = pnand %p683_p7, %p677_p11 }
  0x30   : > { %687 = shalt.err (!%p684_p10)
}
  0x31   : > { %s839_s7 = smov 32   ;;  %s840_s11 = smov 2  }
  0x32   : > { %582 = dma.hbm_to_vmem [thread:$0]  (!%p943_p0), %s937_s6, 128, %s939_s8, %s180_s10, %s839_s7, %s839_s7, %s840_s11  }
  0x33   : > { %p220_p12 = scmp.lt.s32.totalorder %s836_s17, 3  ;;  %s554_s18 = sshll.u32 %s930_s28, 1 }
  0x34   : > { %s555_s19 = sshll.u32 %s832_s16, 5  ;;  %p1130_p9 = scmp.ge.s32.totalorder %s836_s17, 1 }
  0x35   : > { %s988_s29 = scalar_lea.hbm %s1120_s1, %s555_s19  ;;  %s206_s30 = scalar_lea.vmem [#allocation7], %s554_s18 }
  0x36   : > { %p981_p11 = pnand %p1130_p9, %p220_p12  ;;  %s215_s4 = sshll.u32 %s206_s30, 4  ;;  %s216_s4 = int_to_ptr.vmem [resolvable:$true] %s215_s4 }
  0x37   : > { %s203_s6 = scalar_lea.sflag [#allocation8], %s930_s28  ;;  %s688_s8 = scalar_lea.hbm %s988_s29, 32 }
  0x38   : > { %s1131_s21 = scalar_select %p981_p11, 1, 0 }
  0x39   : > { %p689_p1 = scmp.ne.s32.totalorder %s988_s29, %s688_s8  ;;  %s693_s7 = scalar_lea.hbm %s1120_s1, 64 }
  0x3a   : > { %p694_p2 = scmp.lt.u32.totalorder %s988_s29, %s1120_s1  ;;  %p695_p5 = scmp.lt.u32.totalorder %s693_s7, %s688_s8 }
  0x3b   : > { %p691_p6 = pnand %p689_p1, %p660_p3  ;;  %p697_p7 = scmp.lt.u32.totalorder %s688_s8, %s988_s29 }
  0x3c   : > { %p696_p4 = por %p695_p5, %p694_p2 }
  0x3d   : > { %p692_p13 = pneg %p691_p6 }
  0x3e   : > { %p698_p10 = por %p697_p7, %p696_p4 }
  0x40   : > { %p699_p12 = pnand %p698_p10, %p692_p13 }
  0x42   : > { %702 = shalt.err (!%p699_p12)
}
  0x43   : > { %s703_s28 = scalar_lea.vmem %s216_s4, 32  ;;  %s841_s18 = smov [#allocation7]  }
  0x44   : > { %p704_p9 = scmp.ne.s32.totalorder %s216_s4, %s703_s28  ;;  %s708_s22 = sshll.u32 %s841_s18, 4  ;;  %s709_s22 = int_to_ptr.vmem [resolvable:$false] %s708_s22 }
  0x45   : > { %s710_s23 = scalar_lea.vmem %s709_s22, 64  ;;  %p711_p8 = scmp.lt.s32.totalorder %s216_s4, %s709_s22 }
  0x46   : > { %p706_p1 = pnand %p704_p9, %p660_p3  ;;  %p712_p11 = scmp.lt.s32.totalorder %s710_s23, %s703_s28 }
  0x48   : > { %p707_p6 = pneg %p706_p1  ;;  %p713_p2 = por %p712_p11, %p711_p8 }
  0x4a   : > { %p714_p5 = pnand %p713_p2, %p707_p6 }
  0x4c   : > { %717 = shalt.err (!%p714_p5)
}
  0x4d   : > { %585 = dma.hbm_to_vmem [thread:$0]  (!%p943_p0), %s988_s29, 32, %s216_s4, %s203_s6  }
  0x4e   : > { %p1132_p13 = scmp.ne.s32.totalorder %s1131_s21, 0 }
  0x4f   : > { %s1013_s30 = sand.u32 (!%p1132_p13), 1, %s820_s13   ;;  %p1133_p3 = scmp.ne.s32.totalorder (!%p1132_p13), %s1126_s24, 0 }
  0x50   : > { %224 = sbr.rel (%p1132_p13) target bundleno = 402 (0x192), region = 28  ;;  %s557_s8 = sshll.u32 (!%p1132_p13), %s1013_s30, 3 }
  0x51   : > { %s227_s10 = scalar_lea.sflag (!%p1132_p13), [#allocation5], %s1013_s30  ;;  %s230_s5 = scalar_lea.vmem (!%p1132_p13), [#allocation4], %s557_s8 }
  0x57   : > { %799 = dma.done.wait (%p1133_p3), %s227_s10, 128  }
  0x58   : > { %801 = vsyncadd (%p1133_p3), %s227_s10, 4294967168  ;;  %s558_s9 = sshll.u32 %s1013_s30, 1  ;;  %s236_s21 = scalar_lea.sflag [#allocation8], %s1013_s30 }
  0x59   : > { %s239_s29 = scalar_lea.vmem [#allocation7], %s558_s9 }
  0x5a   : > { %803 = dma.done.wait (%p1133_p3), %s236_s21, 32  }
  0x5b   : > { %805 = vsyncadd (%p1133_p3), %s236_s21, 4294967264  ;;  %v842_v0 = vmov 0.0   ;;  %v278_v1 = vld [vmem:[%s230_s5] sm:$0x3]  ;;  %v559_v2 = vld [vmem:[%s230_s5 + $0x2] sm:$0x3] }
  0x5c   : > { %276 = vst [vmem:[#allocation2] sm:$0x1] %v842_v0  ;;  %277 = vst [vmem:[#allocation3] sm:$0x1] %v842_v0  ;;  %v560_v3 = vld [vmem:[%s230_s5 + $0x4] sm:$0x3]  ;;  %v286_v4 = vmax.f32 %v278_v1, %v559_v2 }
  0x5d   : > { %v561_v5 = vld [vmem:[%s230_s5 + $0x6] sm:$0x3]  ;;  %v285_v16 = vld [vmem:[%s239_s29] sm:$0x3]  ;;  %vm330_vm4 = vcmask 1041408   ;;  %vm354_vm5 = vcmask 1040384  }
  0x5e   : > { %v287_v6 = vmax.f32 %v286_v4, %v560_v3  ;;  %vm292_vm0 = vcmp.eq.s32.totalorder %v285_v16, 0  ;;  %vm299_vm1 = vcmp.eq.s32.totalorder %v285_v16, 1  ;;  %vm308_vm2 = vcmp.eq.s32.totalorder %v285_v16, 2  ;;  %s562_s24 = sshll.u32 %s828_s15, 4  ;;  %s263_s4 = scalar_lea.vmem [#allocation9], %s1013_s30 }
  0x5f   : > { %vm317_vm3 = vcmp.eq.s32.totalorder %v285_v16, 3  ;;  %s398_s6 = sshll.u32 %s263_s4, 4  ;;  %s269_s7 = scalar_lea.vmem [#allocation10], %s1013_s30  ;;  %s1039_s6 = int_to_ptr.vmem [resolvable:$true] %s398_s6 }
  0x60   : > { %v288_v7 = vmax.f32 %v287_v6, %v561_v5  ;;  %s412_s11 = sshll.u32 %s269_s7, 4  ;;  %s1037_s18 = scalar_lea.hbm %s1121_s2, %s562_s24  ;;  %s1041_s11 = int_to_ptr.vmem [resolvable:$true] %s412_s11 }
  0x61   : > { %s381_s23 = scalar_lea.sflag [#allocation6], %s1013_s30  ;;  %s718_s8 = scalar_lea.vmem %s1039_s6, 16 }
  0x62   : > { %v289_v8 = vsub.f32 %v278_v1, %v288_v7  ;;  %v295_v9 = vsub.f32 %v559_v2, %v288_v7  ;;  %v304_v10 = vsub.f32 %v560_v3, %v288_v7  ;;  %v313_v11 = vsub.f32 %v561_v5, %v288_v7  ;;  %p719_p8 = scmp.ne.s32.totalorder %s1039_s6, %s718_s8  ;;  %p1134_p0 = scmp.ne.s32.totalorder %s1127_s25, 0 }
  0x63   : > { %v329_v55 = vld [vmem:[#allocation2] sm:$0x1]  ;;  %v340_v60 = vld [vmem:[#allocation3] sm:$0x1]  ;;  %s843_s10 = smov [#allocation9]  }
  0x64   : > { %v290_v12 = vmul.f32 1.442695, %v289_v8  ;;  %v296_v13 = vmul.f32 1.442695, %v295_v9  ;;  %v305_v14 = vmul.f32 1.442695, %v304_v10  ;;  %p720_p11 = pnand %p719_p8, %p1134_p0 }
  0x65   : > { %v314_v15 = vmul.f32 1.442695, %v313_v11  ;;  %v293_v25 = vsel %vm292_vm0, %v289_v8, 0.0  ;;  %v300_v26 = vsel %vm299_vm1, %v295_v9, 0.0  ;;  %v309_v31 = vsel %vm308_vm2, %v304_v10, 0.0  ;;  %s722_s5 = sshll.u32 %s843_s10, 4  ;;  %s723_s5 = int_to_ptr.vmem [resolvable:$false] %s722_s5 }
  0x66   : > { %646 = vpow2.f32 %v290_v12  ;;  %v301_v29 = vadd.f32 %v300_v26, %v293_v25  ;;  %v318_v35 = vsel %vm317_vm3, %v313_v11, 0.0  ;;  %p721_p4 = pneg %p720_p11  ;;  %s724_s9 = scalar_lea.vmem %s723_s5, 32 }
  0x67   : > { %648 = vpow2.f32 %v296_v13  ;;  %p725_p7 = scmp.lt.s32.totalorder %s1039_s6, %s723_s5  ;;  %p726_p10 = scmp.lt.s32.totalorder %s724_s9, %s718_s8 }
  0x68   : > { %650 = vpow2.f32 %v305_v14  ;;  %v310_v33 = vadd.f32 %v309_v31, %v301_v29 }
  0x69   : > { %652 = vpow2.f32 %v314_v15  ;;  %p727_p12 = por %p726_p10, %p725_p7 }
  0x6a   : > { %v319_v37 = vadd.f32 %v318_v35, %v310_v33 }
  0x6b   : > { %p728_p9 = pnand %p727_p12, %p721_p4 }
  0x70   : > { %v647_v17 = vpop.eup %646 }
  0x71   : > { %v649_v18 = vpop.eup %648  ;;  %v294_v23 = vsel %vm292_vm0, %v647_v17, 0.0 }
  0x72   : > { %v651_v19 = vpop.eup %650  ;;  %v298_v20 = vadd.f32 %v649_v18, %v647_v17  ;;  %v302_v24 = vsel %vm299_vm1, %v649_v18, 0.0 }
  0x73   : > { %v653_v21 = vpop.eup %652  ;;  %v303_v28 = vadd.f32 %v302_v24, %v294_v23  ;;  %v311_v30 = vsel %vm308_vm2, %v651_v19, 0.0 }
  0x74   : > { %v307_v22 = vadd.f32 %v651_v19, %v298_v20  ;;  %v320_v34 = vsel %vm317_vm3, %v653_v21, 0.0 }
  0x75   : > { %v312_v32 = vadd.f32 %v311_v30, %v303_v28 }
  0x76   : > { %v316_v27 = vadd.f32 %v653_v21, %v307_v22 }
  0x77   : > { %v321_v36 = vadd.f32 %v320_v34, %v312_v32 }
  0x78   : > { %654 = vlog2.f32 %v316_v27 }
  0x79   : > { %656 = vrcp.f32 %v316_v27 }
  0x82   : > { %v655_v38 = vpop.eup %654 }
  0x83   : > { %v657_v39 = vpop.eup %656  ;;  %v323_v40 = vmul.f32 0.6931472, %v655_v38 }
  0x84   : > { %v326_v41 = vmul.f32 %v657_v39, %v321_v36 }
  0x85   : > { %v324_v42 = vsub.f32 %v323_v40, %v319_v37 }
  0x86   : > { %v327_v43 = vsub.f32 1.0, %v326_v41 }
  0x87   : > { %v331_v44 = vsel %vm330_vm4, %v324_v42, 0.0 }
  0x88   : > { %v332_v45 = vrot.slane %v331_v44, 4  ;;  %v328_v46 = vmul.f32 %v327_v43, %v327_v43 }
  0x8a   : > { %v333_v47 = vadd.f32 %v332_v45, %v331_v44  ;;  %v341_v48 = vsel %vm330_vm4, %v328_v46, 0.0 }
  0x8b   : > { %v342_v49 = vrot.slane %v341_v48, 4 }
  0x8c   : > { %v334_v50 = vrot.slane %v333_v47, 2 }
  0x8d   : > { %v343_v51 = vadd.f32 %v342_v49, %v341_v48 }
  0x8e   : > { %v335_v52 = vadd.f32 %v334_v50, %v333_v47 }
  0x8f   : > { %v344_v53 = vrot.slane %v343_v51, 2 }
  0x90   : > { %v336_v54 = vrot.slane %v335_v52, 1 }
  0x91   : > { %v345_v56 = vadd.f32 %v344_v53, %v343_v51 }
  0x92   : > { %v337_v57 = vadd.f32 %v336_v54, %v335_v52 }
  0x93   : > { %v346_v58 = vrot.slane %v345_v56, 1 }
  0x94   : > { %v338_v59 = vadd.f32 %v337_v57, %v329_v55 }
  0x95   : > { %v347_v61 = vadd.f32 %v346_v58, %v345_v56 }
  0x96   : > { %339 = vst [vmem:[#allocation2] sm:$0x1] %v338_v59 }
  0x97   : > { %v348_v62 = vadd.f32 %v347_v61, %v340_v60 }
  0x99   : > { %349 = vst [vmem:[#allocation3] sm:$0x1] %v348_v62 }
  0x9d   : > { %v353_v63 = vld [vmem:[#allocation2] sm:$0x1] }
  0x9e   : > { %v355_v0 = vsel %vm354_vm5, %v353_v63, 0.0 }
  0x9f   : > { %356 = vadd.xlane.f32.xlu0 %v355_v0 }
  0xa0   : > { %v367_v1 = vld [vmem:[#allocation3] sm:$0x1] }
  0xa1   : > { %v368_v2 = vsel %vm354_vm5, %v367_v1, 0.0 }
  0xa3   : > { %369 = vadd.xlane.f32.xlu0 %v368_v2 }
 0x12c   : > { %v357_v3 = vpop.xlane.xlu0 %356 }
 0x12d   : > { %v358_v4 = vrot.slane %v357_v3, 4 }
 0x12f   : > { %v359_v5 = vadd.f32 %v358_v4, %v357_v3 }
 0x130   : > { %v370_v6 = vpop.xlane.xlu0 %369 }
 0x131   : > { %v360_v7 = vrot.slane %v359_v5, 2  ;;  %v371_v8 = vrot.slane %v370_v6, 4 }
 0x133   : > { %v372_v9 = vadd.f32 %v371_v8, %v370_v6  ;;  %v361_v10 = vadd.f32 %v360_v7, %v359_v5 }
 0x135   : > { %v373_v11 = vrot.slane %v372_v9, 2  ;;  %v362_v12 = vrot.slane %v361_v10, 1 }
 0x137   : > { %v374_v13 = vadd.f32 %v373_v11, %v372_v9  ;;  %v363_v14 = vadd.f32 %v362_v12, %v361_v10 }
 0x139   : > { %567 = vpush %v363_v14  ;;  %v375_v15 = vrot.slane %v374_v13, 1 }
 0x13b   : > { %v376_v16 = vadd.f32 %v375_v15, %v374_v13 }
 0x13d   : > { %569 = vpush %v376_v16 }
 0x16a   : > { %s568_s22 = spop %567 }
 0x16b   : > { %v365_v17 = vstv %s568_s22 }
 0x16c   : > { %366 = vst [vmem:[%s263_s4] sm:$0x1] %v365_v17 }
 0x16d   : > { %731 = shalt.err (!%p728_p9)
}
 0x16e   : > { %s732_s21 = scalar_lea.hbm %s1037_s18, 16  ;;  %s736_s19 = scalar_lea.hbm %s1121_s2, 32 }
 0x16f   : > { %p733_p1 = scmp.ne.s32.totalorder %s1037_s18, %s732_s21  ;;  %p737_p5 = scmp.lt.u32.totalorder %s1037_s18, %s1121_s2 }
 0x170   : > { %p738_p13 = scmp.lt.u32.totalorder %s736_s19, %s732_s21  ;;  %p740_p8 = scmp.lt.u32.totalorder %s732_s21, %s1037_s18 }
 0x171   : > { %p734_p6 = pnand %p733_p1, %p1134_p0 }
 0x172   : > { %p739_p3 = por %p738_p13, %p737_p5 }
 0x173   : > { %p735_p2 = pneg %p734_p6 }
 0x174   : > { %p741_p11 = por %p740_p8, %p739_p3 }
 0x176   : > { %p742_p4 = pnand %p741_p11, %p735_p2 }
 0x178   : > { %745 = shalt.err (!%p742_p4)
}
 0x179   : > { %575 = dma.vmem_to_hbm [thread:$0]  (%p1134_p0), %s1039_s6, 16, %s1037_s18, %s381_s23  }
 0x17a   : > { %s570_s8 = spop %569  ;;  %s1070_s9 = scalar_lea.hbm %s1122_s3, %s562_s24 }
 0x17b   : > { %v378_v18 = vstv %s570_s8  ;;  %s385_s21 = scalar_lea.sflag [#allocation11], %s1013_s30  ;;  %s746_s29 = scalar_lea.vmem %s1041_s11, 16 }
 0x17c   : > { %379 = vst [vmem:[%s269_s7] sm:$0x1] %v378_v18  ;;  %p747_p7 = scmp.ne.s32.totalorder %s1041_s11, %s746_s29  ;;  %s844_s4 = smov [#allocation10]  }
 0x17d   : > { %s750_s19 = sshll.u32 %s844_s4, 4  ;;  %s751_s19 = int_to_ptr.vmem [resolvable:$false] %s750_s19 }
 0x17e   : > { %p748_p10 = pnand %p747_p7, %p1134_p0  ;;  %s752_s6 = scalar_lea.vmem %s751_s19, 32 }
 0x17f   : > { %p753_p9 = scmp.lt.s32.totalorder %s1041_s11, %s751_s19  ;;  %p754_p1 = scmp.lt.s32.totalorder %s752_s6, %s746_s29 }
 0x180   : > { %p749_p12 = pneg %p748_p10 }
 0x181   : > { %p755_p6 = por %p754_p1, %p753_p9 }
 0x183   : > { %p756_p2 = pnand %p755_p6, %p749_p12 }
 0x185   : > { %759 = shalt.err (!%p756_p2)
}
 0x186   : > { %s760_s15 = scalar_lea.hbm %s1070_s9, 16  ;;  %s764_s7 = scalar_lea.hbm %s1122_s3, 32 }
 0x187   : > { %p761_p5 = scmp.ne.s32.totalorder %s1070_s9, %s760_s15  ;;  %p765_p8 = scmp.lt.u32.totalorder %s1070_s9, %s1122_s3 }
 0x188   : > { %p766_p11 = scmp.lt.u32.totalorder %s764_s7, %s760_s15  ;;  %p768_p7 = scmp.lt.u32.totalorder %s760_s15, %s1070_s9 }
 0x189   : > { %p762_p13 = pnand %p761_p5, %p1134_p0 }
 0x18a   : > { %p767_p4 = por %p766_p11, %p765_p8 }
 0x18b   : > { %p763_p3 = pneg %p762_p13 }
 0x18c   : > { %p769_p10 = por %p768_p7, %p767_p4 }
 0x18e   : > { %p770_p12 = pnand %p769_p10, %p763_p3 }
 0x190   : > { %773 = shalt.err (!%p770_p12)
}
 0x191   : > { %576 = dma.vmem_to_hbm [thread:$0]  (%p1134_p0), %s1041_s11, 16, %s1070_s9, %s385_s21  }
 0x192 PF: > { %s424_s28 = sand.u32 1, %s816_s12   ;;  %p1135_p9 = scmp.ne.s32.totalorder %s1128_s27, 0 }
 0x193   : > { %p1136_p1 = scmp.ge.s32.totalorder %s836_s17, 2  ;;  %s425_s22 = scalar_lea.sflag [#allocation6], %s424_s28 }
 0x195   : > { %p587_p6 = pnand %p1136_p1, %p1135_p9 }
 0x197   : > { %807 = dma.done.wait (!%p587_p6), %s425_s22, 16  }
 0x198   : > { %809 = vsyncadd (!%p587_p6), %s425_s22, 4294967280  ;;  %s433_s8 = scalar_lea.sflag [#allocation11], %s424_s28 }
 0x199   : > { %811 = dma.done.wait (!%p587_p6), %s433_s8, 16  }
 0x19a   : > { %813 = vsyncadd (!%p587_p6), %s433_s8, 4294967280  ;;  %s26_s17 = sadd.s32 1, %s836_s17   ;;  %s1137_s12 = smov %s820_s13 }
 0x19b   : > { %p23_p2 = scmp.ge.s32.totalorder %s26_s17, 4   ;;  %s1138_s13 = smov %s824_s14 }
 0x19c   : > { %s1139_s14 = smov %s921_s26  ;;  %s1140_s15 = smov %s832_s16 }
 0x19d   : > { %s1141_s16 = smov %s1143_s20  ;;  %25 = sbr.rel (!%p23_p2) target bundleno = 10 (0xa), region = 114 }
 0x1a4   :  { %437 = vsyncpa [#allocation5], 1 }
 0x1a5   :  { %439 = vsyncpa [#allocation5 + $0x1], 1 }
 0x1a6   :  { %440 = vsyncpa [#allocation8], 1 }
 0x1a7   :  { %442 = vsyncpa [#allocation8 + $0x1], 1 }
 0x1a8   :  { %443 = vsyncpa [#allocation6], 1 }
 0x1a9   :  { %445 = vsyncpa [#allocation6 + $0x1], 1 }
 0x1aa   :  { %446 = vsyncpa [#allocation11], 1 }
 0x1ab   :  { %448 = vsyncpa [#allocation11 + $0x1], 1 }

</bundles_post_ra>
